<compile_context>
chip_gen: v6e
topology: v6e:2x2x1
jax: 0.10.0
libtpu: 0.0.40
codegen_flags: <defaults>
</compile_context>

<pallas_src>
from functools import partial

import jax
import jax.numpy as jnp
import numpy as np
from jax import lax
from jax.experimental import pallas as pl
from jax.experimental.pallas import tpu as pltpu

_LANE = 128
_SUBLANE = 8


def _round_up(n, m):
    return ((n + m - 1) // m) * m


def _spectral_mul_kernel(x_ref, w_ref, o_ref, *, co_tile, unroll):
    """Per-frequency complex contraction over the input-channel axis.

    x_ref : (Cin, 2, TB, TP)        [real, imag] kept Fourier coeffs, Cin major
    w_ref : (Cin, 3, Cout_pad, TP)  Gauss planes [wr, wr+wi, wi-wr]
    o_ref : (2, TB, Cout_pad, TP)   [real, imag] output coefficients

    out[b, o, p] = sum_i x[b, i, p] * w[i, o, p]   (complex, per retained mode p)
    """
    cin = x_ref.shape[0]
    tb, tp = x_ref.shape[2], x_ref.shape[3]
    co_pad = w_ref.shape[2]

    # Cout is chunked so each accumulator stays within ~8 vregs; every chunk's live
    # range ends at its store.  Cin runs under fori_loop so live ranges stay bounded
    # even for large channel counts (no fully-unrolled MAC body).
    for j in range(co_pad // co_tile):
        j0 = j * co_tile
        j1 = j0 + co_tile

        def body(c, carry, j0=j0, j1=j1):
            acc_r, acc_i = carry
            xr = x_ref[c, 0, :, :]              # (TB, TP)
            xi = x_ref[c, 1, :, :]
            wr = w_ref[c, 0, j0:j1, :]          # (co_tile, TP)  = wr
            ws = w_ref[c, 1, j0:j1, :]          #                = wr + wi
            wd = w_ref[c, 2, j0:j1, :]          #                = wi - wr

            s_b = (xr + xi)[:, None, :]         # shared over Cout (cheap add)
            xr_b = xr[:, None, :]
            xi_b = xi[:, None, :]

            # Gauss 3-multiply complex product:
            #   k1 = wr*(xr+xi);  re += k1 - xi*(wr+wi);  im += k1 + xr*(wi-wr)
            k1 = wr[None, :, :] * s_b           # (TB, co_tile, TP)
            acc_r = acc_r + (k1 - xi_b * ws[None, :, :])
            acc_i = acc_i + (k1 + xr_b * wd[None, :, :])
            return acc_r, acc_i

        acc0 = jnp.zeros((tb, co_tile, tp), jnp.float32)
        acc_r, acc_i = lax.fori_loop(0, cin, body, (acc0, acc0), unroll=unroll)

        o_ref[0, :, j0:j1, :] = acc_r
        o_ref[1, :, j0:j1, :] = acc_i


def _select_tiles(cin, co_pad, b_pad, pp):
    """Pick (tb, tp) honoring the sublane rules, an accumulator vreg budget and a
    conservative (all-generation) double-buffered VMEM budget."""
    acc_budget = 8192                   # f32 elems per accumulator (~8 vregs)
    co_tile = min(co_pad, _SUBLANE)
    vmem_budget = 20 * 1024 * 1024      # bytes; comfortably under the 32 MiB limit

    def batch_tiles():
        tiles = [b_pad]                 # full-batch block is always legal
        if b_pad % _SUBLANE == 0:
            tiles += [t for t in (32, 24, 16, 8) if t < b_pad and b_pad % t == 0]
        return sorted(set(tiles), reverse=True)

    def vmem_bytes(tb, tp):
        x_blk = cin * 2 * tb * tp
        w_blk = cin * 3 * co_pad * tp
        o_blk = 2 * tb * co_pad * tp
        return 4 * 2 * (x_blk + w_blk + o_blk)   # f32, double-buffered

    best = None
    for tp in (256, 128):
        if pp % tp:
            continue
        for tb in batch_tiles():
            fits_acc = tb * co_tile * tp <= acc_budget
            fits_vmem = vmem_bytes(tb, tp) <= vmem_budget
            if fits_acc and fits_vmem:
                return tb, tp
            cand = (vmem_bytes(tb, tp), tb * co_tile * tp, tb, tp)
            if best is None or cand < best:
                best = cand
    if best is None:               # unreachable: pp is always a multiple of 128
        return b_pad, pp
    return best[2], best[3]        # smallest-footprint legal fallback


def _compl_mul_pallas(x_planar, w_planar):
    """x_planar: (Cin, 2, B, Pp) f32, w_planar: (Cin, 3, Cout_pad, Pp) f32
    -> (2, B_pad, Cout_pad, Pp) f32  (caller slices off batch/Cout padding)."""
    ci, _, b, pp = x_planar.shape
    co_pad = w_planar.shape[2]

    # Pad batch to a multiple of 8 only when that is needed for a legal batch tile.
    b_pad = b if (b <= _SUBLANE or b % _SUBLANE == 0) else _round_up(b, _SUBLANE)
    if b_pad != b:
        x_planar = jnp.pad(x_planar, ((0, 0), (0, 0), (0, b_pad - b), (0, 0)))

    tb, tp = _select_tiles(ci, co_pad, b_pad, pp)
    co_tile = min(co_pad, _SUBLANE)
    unroll = int(max(1, min(ci, 8)))
    # Mode axis OUTER, batch axis inner: the weight block index is constant across
    # consecutive (inner) steps, so its HBM->VMEM DMA is elided.
    grid = (pp // tp, b_pad // tb)

    kernel = partial(_spectral_mul_kernel, co_tile=co_tile, unroll=unroll)

    out = pl.pallas_call(
        kernel,
        out_shape=jax.ShapeDtypeStruct((2, b_pad, co_pad, pp), jnp.float32),
        grid_spec=pltpu.PrefetchScalarGridSpec(
            num_scalar_prefetch=0,
            grid=grid,
            in_specs=[
                pl.BlockSpec((ci, 2, tb, tp), lambda pi, bi: (0, 0, bi, pi)),
                pl.BlockSpec((ci, 3, co_pad, tp), lambda pi, bi: (0, 0, 0, pi)),
            ],
            out_specs=pl.BlockSpec((2, tb, co_pad, tp),
                                   lambda pi, bi: (0, bi, 0, pi)),
        ),
        compiler_params=pltpu.CompilerParams(
            dimension_semantics=("parallel", "parallel"),
            vmem_limit_bytes=32 * 1024 * 1024),
    )(x_planar, w_planar)
    return out


def prepare_spectral_weights(weights1, weights2):
    """One-time (hoisted) conversion of the complex spectral weights into the fused,
    planar, lane/sublane-padded layout the kernel consumes.

    Returns (Cin, 3, Cout_pad, Pp) float32; the 3 planes along axis 1 are
    [wr, wr + wi, wi - wr] for the Gauss 3-multiply complex product."""
    ci, co, m1, m2 = weights1.shape
    p = m1 * m2
    p2 = 2 * p
    pp = _round_up(p2, _LANE)
    co_pad = _round_up(co, _SUBLANE)

    w = jnp.concatenate(
        [weights1.reshape(ci, co, p), weights2.reshape(ci, co, p)], axis=-1)
    wr = jnp.real(w).astype(jnp.float32)
    wi = jnp.imag(w).astype(jnp.float32)
    planes = jnp.stack([wr, wr + wi, wi - wr], axis=1)          # (Cin, 3, Cout, 2P)
    return jnp.pad(planes, ((0, 0), (0, 0), (0, co_pad - co), (0, pp - p2)))


def spectral_conv2d_fast(x, w_planar, modes1, modes2, out_channels):
    """Forward pass of SpectralConv2d_fast.

    x        : (B, Cin, H, W) float32
    w_planar : (Cin, 3, Cout_pad, Pp) float32  (from prepare_spectral_weights)
    returns  : (B, Cout, H, W) float32
    """
    b, ci, h, w = x.shape
    co = out_channels
    pp = w_planar.shape[3]
    wf = w // 2 + 1
    p = modes1 * modes2
    p2 = 2 * p
    assert modes2 <= wf and 2 * modes1 <= h, "mode blocks would overlap / overflow"
    assert pp >= p2 and pp % _LANE == 0 and w_planar.shape[2] >= co

    x_ft = jnp.fft.rfft2(x)  # (B, Cin, H, W//2+1) complex64, norm matches torch

    # Gather the two retained mode blocks and fuse along the flattened mode axis.
    top = x_ft[:, :, :modes1, :modes2].reshape(b, ci, p)
    bot = x_ft[:, :, h - modes1:, :modes2].reshape(b, ci, p)
    xm = jnp.concatenate([top, bot], axis=-1)                     # (B, Cin, 2P)

    # Planar real/imag, contraction axis (Cin) major, lane axis padded to Pp.
    xp = jnp.stack([jnp.real(xm), jnp.imag(xm)], axis=0)          # (2, B, Cin, 2P)
    xp = jnp.transpose(xp, (2, 0, 1, 3)).astype(jnp.float32)      # (Cin, 2, B, 2P)
    xp = jnp.pad(xp, ((0, 0), (0, 0), (0, 0), (0, pp - p2)))      # (Cin, 2, B, Pp)

    op = _compl_mul_pallas(xp, w_planar)                          # (2, Bp, Cop, Pp)
    op = op[:, :b, :co, :p2]
    o = (op[0] + 1j * op[1]).astype(jnp.complex64)                # (B, Cout, 2P)
    out_top = o[:, :, :p].reshape(b, co, modes1, modes2)
    out_bot = o[:, :, p:].reshape(b, co, modes1, modes2)

    # Assemble out_ft in one pass (pad + concat) instead of zeros + two scatters.
    pad_cols = wf - modes2
    top_rows = jnp.pad(out_top, ((0, 0), (0, 0), (0, 0), (0, pad_cols)))
    bot_rows = jnp.pad(out_bot, ((0, 0), (0, 0), (0, 0), (0, pad_cols)))
    mid_rows = jnp.zeros((b, co, h - 2 * modes1, wf), jnp.complex64)
    out_ft = jnp.concatenate([top_rows, mid_rows, bot_rows], axis=2)

    return jnp.fft.irfft2(out_ft, s=(h, w)).astype(jnp.float32)


def _reference(x, weights1, weights2, modes1, modes2):
    """Pure-JAX reference mirroring the PyTorch forward exactly."""
    b, ci, h, w = x.shape
    co = weights1.shape[1]
    wf = w // 2 + 1
    x_ft = jnp.fft.rfft2(x)
    out_ft = jnp.zeros((b, co, h, wf), jnp.complex64)
    top = jnp.einsum('bixy,ioxy->boxy', x_ft[:, :, :modes1, :modes2], weights1)
    bot = jnp.einsum('bixy,ioxy->boxy', x_ft[:, :, h - modes1:, :modes2], weights2)
    out_ft = out_ft.at[:, :, :modes1, :modes2].set(top)
    out_ft = out_ft.at[:, :, h - modes1:, :modes2].set(bot)
    return jnp.fft.irfft2(out_ft, s=(h, w)).astype(jnp.float32)


if __name__ == "__main__":
    # Small, module-consistent shapes.
    B, Cin, Cout = 2, 4, 4
    H = W = 16
    modes1 = modes2 = 4

    key = jax.random.PRNGKey(0)
    kx, kw1r, kw1i, kw2r, kw2i = jax.random.split(key, 5)

    x = jax.random.normal(kx, (B, Cin, H, W), dtype=jnp.float32)

    # Deterministic parameter init mirroring:  scale * torch.rand(..., dtype=cfloat)
    scale = 1.0 / (Cin * Cout)
    wshape = (Cin, Cout, modes1, modes2)
    weights1 = (scale * (jax.random.uniform(kw1r, wshape)
                         + 1j * jax.random.uniform(kw1i, wshape))).astype(jnp.complex64)
    weights2 = (scale * (jax.random.uniform(kw2r, wshape)
                         + 1j * jax.random.uniform(kw2i, wshape))).astype(jnp.complex64)

    # Weight planarization hoisted out of the per-forward path (done once).
    w_planar = jax.block_until_ready(prepare_spectral_weights(weights1, weights2))

    fwd = jax.jit(spectral_conv2d_fast,
                  static_argnames=("modes1", "modes2", "out_channels"))
    out = jax.block_until_ready(
        fwd(x, w_planar, modes1=modes1, modes2=modes2, out_channels=Cout))

    ref = jax.block_until_ready(_reference(x, weights1, weights2, modes1, modes2))
    assert out.shape == (B, Cout, H, W)
    assert np.allclose(np.asarray(out), np.asarray(ref), atol=1e-4, rtol=1e-4)

    print("KERNEL_OK")
</pallas_src>

<mosaic_0001>
module attributes {stable_mosaic.version = 11 : i64} {
  func.func @_spectral_mul_kernel(%arg0: i32, %arg1: i32, %arg2: memref<4x2x2x128xf32, #tpu.memory_space<vmem>>, %arg3: memref<4x3x8x128xf32, #tpu.memory_space<vmem>>, %arg4: memref<2x2x8x128xf32, #tpu.memory_space<vmem>>) attributes {dimension_semantics = [#tpu.dimension_semantics<parallel>, #tpu.dimension_semantics<parallel>], iteration_bounds = array<i64: 1, 1>, scalar_prefetch = 0 : i64, scratch_operands = 0 : i64, tpu.core_type = #tpu.core_type<tc>, window_params = [{transform_indices = @transform_0, window_bounds = array<i64: 4, 2, 2, 128>}, {transform_indices = @transform_1, window_bounds = array<i64: 4, 3, 8, 128>}, {transform_indices = @transform_2, window_bounds = array<i64: 2, 2, 8, 128>}]} {
    %cst = arith.constant 0.000000e+00 : f32
    %0 = vector.broadcast %cst : f32 to vector<2x8x128xf32>
    %c0_i32 = arith.constant 0 : i32
    %1 = arith.index_cast %c0_i32 : i32 to index
    %c0 = arith.constant 0 : index
    %c0_0 = arith.constant 0 : index
    %c0_1 = arith.constant 0 : index
    %2 = vector.load %arg2[%1, %c0, %c0_0, %c0_1] : memref<4x2x2x128xf32, #tpu.memory_space<vmem>>, vector<1x1x2x128xf32>
    %3 = vector.shape_cast %2 : vector<1x1x2x128xf32> to vector<2x128xf32>
    %4 = arith.index_cast %c0_i32 : i32 to index
    %c1 = arith.constant 1 : index
    %c0_2 = arith.constant 0 : index
    %c0_3 = arith.constant 0 : index
    %5 = vector.load %arg2[%4, %c1, %c0_2, %c0_3] : memref<4x2x2x128xf32, #tpu.memory_space<vmem>>, vector<1x1x2x128xf32>
    %6 = vector.shape_cast %5 : vector<1x1x2x128xf32> to vector<2x128xf32>
    %7 = arith.index_cast %c0_i32 : i32 to index
    %c0_4 = arith.constant 0 : index
    %c0_5 = arith.constant 0 : index
    %c0_6 = arith.constant 0 : index
    %8 = vector.load %arg3[%7, %c0_4, %c0_5, %c0_6] : memref<4x3x8x128xf32, #tpu.memory_space<vmem>>, vector<1x1x8x128xf32>
    %9 = vector.shape_cast %8 : vector<1x1x8x128xf32> to vector<8x128xf32>
    %10 = arith.index_cast %c0_i32 : i32 to index
    %c1_7 = arith.constant 1 : index
    %c0_8 = arith.constant 0 : index
    %c0_9 = arith.constant 0 : index
    %11 = vector.load %arg3[%10, %c1_7, %c0_8, %c0_9] : memref<4x3x8x128xf32, #tpu.memory_space<vmem>>, vector<1x1x8x128xf32>
    %12 = vector.shape_cast %11 : vector<1x1x8x128xf32> to vector<8x128xf32>
    %13 = arith.index_cast %c0_i32 : i32 to index
    %c2 = arith.constant 2 : index
    %c0_10 = arith.constant 0 : index
    %c0_11 = arith.constant 0 : index
    %14 = vector.load %arg3[%13, %c2, %c0_10, %c0_11] : memref<4x3x8x128xf32, #tpu.memory_space<vmem>>, vector<1x1x8x128xf32>
    %15 = vector.shape_cast %14 : vector<1x1x8x128xf32> to vector<8x128xf32>
    %16 = arith.addf %3, %6 : vector<2x128xf32>
    %17 = vector.shape_cast %16 : vector<2x128xf32> to vector<2x1x128xf32>
    %18 = vector.shape_cast %3 : vector<2x128xf32> to vector<2x1x128xf32>
    %19 = vector.shape_cast %6 : vector<2x128xf32> to vector<2x1x128xf32>
    %20 = vector.shape_cast %9 : vector<8x128xf32> to vector<1x8x128xf32>
    %21 = vector.broadcast %20 : vector<1x8x128xf32> to vector<2x8x128xf32>
    %22 = vector.broadcast %17 : vector<2x1x128xf32> to vector<2x8x128xf32>
    %23 = arith.mulf %21, %22 : vector<2x8x128xf32>
    %24 = vector.shape_cast %12 : vector<8x128xf32> to vector<1x8x128xf32>
    %25 = vector.broadcast %19 : vector<2x1x128xf32> to vector<2x8x128xf32>
    %26 = vector.broadcast %24 : vector<1x8x128xf32> to vector<2x8x128xf32>
    %27 = arith.mulf %25, %26 : vector<2x8x128xf32>
    %28 = arith.subf %23, %27 : vector<2x8x128xf32>
    %29 = arith.addf %0, %28 : vector<2x8x128xf32>
    %30 = vector.shape_cast %15 : vector<8x128xf32> to vector<1x8x128xf32>
    %31 = vector.broadcast %18 : vector<2x1x128xf32> to vector<2x8x128xf32>
    %32 = vector.broadcast %30 : vector<1x8x128xf32> to vector<2x8x128xf32>
    %33 = arith.mulf %31, %32 : vector<2x8x128xf32>
    %34 = arith.addf %23, %33 : vector<2x8x128xf32>
    %35 = arith.addf %0, %34 : vector<2x8x128xf32>
    %c1_i32 = arith.constant 1 : i32
    %36 = arith.index_cast %c1_i32 : i32 to index
    %c0_12 = arith.constant 0 : index
    %c0_13 = arith.constant 0 : index
    %c0_14 = arith.constant 0 : index
    %37 = vector.load %arg2[%36, %c0_12, %c0_13, %c0_14] : memref<4x2x2x128xf32, #tpu.memory_space<vmem>>, vector<1x1x2x128xf32>
    %38 = vector.shape_cast %37 : vector<1x1x2x128xf32> to vector<2x128xf32>
    %39 = arith.index_cast %c1_i32 : i32 to index
    %c1_15 = arith.constant 1 : index
    %c0_16 = arith.constant 0 : index
    %c0_17 = arith.constant 0 : index
    %40 = vector.load %arg2[%39, %c1_15, %c0_16, %c0_17] : memref<4x2x2x128xf32, #tpu.memory_space<vmem>>, vector<1x1x2x128xf32>
    %41 = vector.shape_cast %40 : vector<1x1x2x128xf32> to vector<2x128xf32>
    %42 = arith.index_cast %c1_i32 : i32 to index
    %c0_18 = arith.constant 0 : index
    %c0_19 = arith.constant 0 : index
    %c0_20 = arith.constant 0 : index
    %43 = vector.load %arg3[%42, %c0_18, %c0_19, %c0_20] : memref<4x3x8x128xf32, #tpu.memory_space<vmem>>, vector<1x1x8x128xf32>
    %44 = vector.shape_cast %43 : vector<1x1x8x128xf32> to vector<8x128xf32>
    %45 = arith.index_cast %c1_i32 : i32 to index
    %c1_21 = arith.constant 1 : index
    %c0_22 = arith.constant 0 : index
    %c0_23 = arith.constant 0 : index
    %46 = vector.load %arg3[%45, %c1_21, %c0_22, %c0_23] : memref<4x3x8x128xf32, #tpu.memory_space<vmem>>, vector<1x1x8x128xf32>
    %47 = vector.shape_cast %46 : vector<1x1x8x128xf32> to vector<8x128xf32>
    %48 = arith.index_cast %c1_i32 : i32 to index
    %c2_24 = arith.constant 2 : index
    %c0_25 = arith.constant 0 : index
    %c0_26 = arith.constant 0 : index
    %49 = vector.load %arg3[%48, %c2_24, %c0_25, %c0_26] : memref<4x3x8x128xf32, #tpu.memory_space<vmem>>, vector<1x1x8x128xf32>
    %50 = vector.shape_cast %49 : vector<1x1x8x128xf32> to vector<8x128xf32>
    %51 = arith.addf %38, %41 : vector<2x128xf32>
    %52 = vector.shape_cast %51 : vector<2x128xf32> to vector<2x1x128xf32>
    %53 = vector.shape_cast %38 : vector<2x128xf32> to vector<2x1x128xf32>
    %54 = vector.shape_cast %41 : vector<2x128xf32> to vector<2x1x128xf32>
    %55 = vector.shape_cast %44 : vector<8x128xf32> to vector<1x8x128xf32>
    %56 = vector.broadcast %55 : vector<1x8x128xf32> to vector<2x8x128xf32>
    %57 = vector.broadcast %52 : vector<2x1x128xf32> to vector<2x8x128xf32>
    %58 = arith.mulf %56, %57 : vector<2x8x128xf32>
    %59 = vector.shape_cast %47 : vector<8x128xf32> to vector<1x8x128xf32>
    %60 = vector.broadcast %54 : vector<2x1x128xf32> to vector<2x8x128xf32>
    %61 = vector.broadcast %59 : vector<1x8x128xf32> to vector<2x8x128xf32>
    %62 = arith.mulf %60, %61 : vector<2x8x128xf32>
    %63 = arith.subf %58, %62 : vector<2x8x128xf32>
    %64 = arith.addf %29, %63 : vector<2x8x128xf32>
    %65 = vector.shape_cast %50 : vector<8x128xf32> to vector<1x8x128xf32>
    %66 = vector.broadcast %53 : vector<2x1x128xf32> to vector<2x8x128xf32>
    %67 = vector.broadcast %65 : vector<1x8x128xf32> to vector<2x8x128xf32>
    %68 = arith.mulf %66, %67 : vector<2x8x128xf32>
    %69 = arith.addf %58, %68 : vector<2x8x128xf32>
    %70 = arith.addf %35, %69 : vector<2x8x128xf32>
    %c2_i32 = arith.constant 2 : i32
    %71 = arith.index_cast %c2_i32 : i32 to index
    %c0_27 = arith.constant 0 : index
    %c0_28 = arith.constant 0 : index
    %c0_29 = arith.constant 0 : index
    %72 = vector.load %arg2[%71, %c0_27, %c0_28, %c0_29] : memref<4x2x2x128xf32, #tpu.memory_space<vmem>>, vector<1x1x2x128xf32>
    %73 = vector.shape_cast %72 : vector<1x1x2x128xf32> to vector<2x128xf32>
    %74 = arith.index_cast %c2_i32 : i32 to index
    %c1_30 = arith.constant 1 : index
    %c0_31 = arith.constant 0 : index
    %c0_32 = arith.constant 0 : index
    %75 = vector.load %arg2[%74, %c1_30, %c0_31, %c0_32] : memref<4x2x2x128xf32, #tpu.memory_space<vmem>>, vector<1x1x2x128xf32>
    %76 = vector.shape_cast %75 : vector<1x1x2x128xf32> to vector<2x128xf32>
    %77 = arith.index_cast %c2_i32 : i32 to index
    %c0_33 = arith.constant 0 : index
    %c0_34 = arith.constant 0 : index
    %c0_35 = arith.constant 0 : index
    %78 = vector.load %arg3[%77, %c0_33, %c0_34, %c0_35] : memref<4x3x8x128xf32, #tpu.memory_space<vmem>>, vector<1x1x8x128xf32>
    %79 = vector.shape_cast %78 : vector<1x1x8x128xf32> to vector<8x128xf32>
    %80 = arith.index_cast %c2_i32 : i32 to index
    %c1_36 = arith.constant 1 : index
    %c0_37 = arith.constant 0 : index
    %c0_38 = arith.constant 0 : index
    %81 = vector.load %arg3[%80, %c1_36, %c0_37, %c0_38] : memref<4x3x8x128xf32, #tpu.memory_space<vmem>>, vector<1x1x8x128xf32>
    %82 = vector.shape_cast %81 : vector<1x1x8x128xf32> to vector<8x128xf32>
    %83 = arith.index_cast %c2_i32 : i32 to index
    %c2_39 = arith.constant 2 : index
    %c0_40 = arith.constant 0 : index
    %c0_41 = arith.constant 0 : index
    %84 = vector.load %arg3[%83, %c2_39, %c0_40, %c0_41] : memref<4x3x8x128xf32, #tpu.memory_space<vmem>>, vector<1x1x8x128xf32>
    %85 = vector.shape_cast %84 : vector<1x1x8x128xf32> to vector<8x128xf32>
    %86 = arith.addf %73, %76 : vector<2x128xf32>
    %87 = vector.shape_cast %86 : vector<2x128xf32> to vector<2x1x128xf32>
    %88 = vector.shape_cast %73 : vector<2x128xf32> to vector<2x1x128xf32>
    %89 = vector.shape_cast %76 : vector<2x128xf32> to vector<2x1x128xf32>
    %90 = vector.shape_cast %79 : vector<8x128xf32> to vector<1x8x128xf32>
    %91 = vector.broadcast %90 : vector<1x8x128xf32> to vector<2x8x128xf32>
    %92 = vector.broadcast %87 : vector<2x1x128xf32> to vector<2x8x128xf32>
    %93 = arith.mulf %91, %92 : vector<2x8x128xf32>
    %94 = vector.shape_cast %82 : vector<8x128xf32> to vector<1x8x128xf32>
    %95 = vector.broadcast %89 : vector<2x1x128xf32> to vector<2x8x128xf32>
    %96 = vector.broadcast %94 : vector<1x8x128xf32> to vector<2x8x128xf32>
    %97 = arith.mulf %95, %96 : vector<2x8x128xf32>
    %98 = arith.subf %93, %97 : vector<2x8x128xf32>
    %99 = arith.addf %64, %98 : vector<2x8x128xf32>
    %100 = vector.shape_cast %85 : vector<8x128xf32> to vector<1x8x128xf32>
    %101 = vector.broadcast %88 : vector<2x1x128xf32> to vector<2x8x128xf32>
    %102 = vector.broadcast %100 : vector<1x8x128xf32> to vector<2x8x128xf32>
    %103 = arith.mulf %101, %102 : vector<2x8x128xf32>
    %104 = arith.addf %93, %103 : vector<2x8x128xf32>
    %105 = arith.addf %70, %104 : vector<2x8x128xf32>
    %c3_i32 = arith.constant 3 : i32
    %106 = arith.index_cast %c3_i32 : i32 to index
    %c0_42 = arith.constant 0 : index
    %c0_43 = arith.constant 0 : index
    %c0_44 = arith.constant 0 : index
    %107 = vector.load %arg2[%106, %c0_42, %c0_43, %c0_44] : memref<4x2x2x128xf32, #tpu.memory_space<vmem>>, vector<1x1x2x128xf32>
    %108 = vector.shape_cast %107 : vector<1x1x2x128xf32> to vector<2x128xf32>
    %109 = arith.index_cast %c3_i32 : i32 to index
    %c1_45 = arith.constant 1 : index
    %c0_46 = arith.constant 0 : index
    %c0_47 = arith.constant 0 : index
    %110 = vector.load %arg2[%109, %c1_45, %c0_46, %c0_47] : memref<4x2x2x128xf32, #tpu.memory_space<vmem>>, vector<1x1x2x128xf32>
    %111 = vector.shape_cast %110 : vector<1x1x2x128xf32> to vector<2x128xf32>
    %112 = arith.index_cast %c3_i32 : i32 to index
    %c0_48 = arith.constant 0 : index
    %c0_49 = arith.constant 0 : index
    %c0_50 = arith.constant 0 : index
    %113 = vector.load %arg3[%112, %c0_48, %c0_49, %c0_50] : memref<4x3x8x128xf32, #tpu.memory_space<vmem>>, vector<1x1x8x128xf32>
    %114 = vector.shape_cast %113 : vector<1x1x8x128xf32> to vector<8x128xf32>
    %115 = arith.index_cast %c3_i32 : i32 to index
    %c1_51 = arith.constant 1 : index
    %c0_52 = arith.constant 0 : index
    %c0_53 = arith.constant 0 : index
    %116 = vector.load %arg3[%115, %c1_51, %c0_52, %c0_53] : memref<4x3x8x128xf32, #tpu.memory_space<vmem>>, vector<1x1x8x128xf32>
    %117 = vector.shape_cast %116 : vector<1x1x8x128xf32> to vector<8x128xf32>
    %118 = arith.index_cast %c3_i32 : i32 to index
    %c2_54 = arith.constant 2 : index
    %c0_55 = arith.constant 0 : index
    %c0_56 = arith.constant 0 : index
    %119 = vector.load %arg3[%118, %c2_54, %c0_55, %c0_56] : memref<4x3x8x128xf32, #tpu.memory_space<vmem>>, vector<1x1x8x128xf32>
    %120 = vector.shape_cast %119 : vector<1x1x8x128xf32> to vector<8x128xf32>
    %121 = arith.addf %108, %111 : vector<2x128xf32>
    %122 = vector.shape_cast %121 : vector<2x128xf32> to vector<2x1x128xf32>
    %123 = vector.shape_cast %108 : vector<2x128xf32> to vector<2x1x128xf32>
    %124 = vector.shape_cast %111 : vector<2x128xf32> to vector<2x1x128xf32>
    %125 = vector.shape_cast %114 : vector<8x128xf32> to vector<1x8x128xf32>
    %126 = vector.broadcast %125 : vector<1x8x128xf32> to vector<2x8x128xf32>
    %127 = vector.broadcast %122 : vector<2x1x128xf32> to vector<2x8x128xf32>
    %128 = arith.mulf %126, %127 : vector<2x8x128xf32>
    %129 = vector.shape_cast %117 : vector<8x128xf32> to vector<1x8x128xf32>
    %130 = vector.broadcast %124 : vector<2x1x128xf32> to vector<2x8x128xf32>
    %131 = vector.broadcast %129 : vector<1x8x128xf32> to vector<2x8x128xf32>
    %132 = arith.mulf %130, %131 : vector<2x8x128xf32>
    %133 = arith.subf %128, %132 : vector<2x8x128xf32>
    %134 = arith.addf %99, %133 : vector<2x8x128xf32>
    %135 = vector.shape_cast %120 : vector<8x128xf32> to vector<1x8x128xf32>
    %136 = vector.broadcast %123 : vector<2x1x128xf32> to vector<2x8x128xf32>
    %137 = vector.broadcast %135 : vector<1x8x128xf32> to vector<2x8x128xf32>
    %138 = arith.mulf %136, %137 : vector<2x8x128xf32>
    %139 = arith.addf %128, %138 : vector<2x8x128xf32>
    %140 = arith.addf %105, %139 : vector<2x8x128xf32>
    %c4_i32 = arith.constant 4 : i32
    %c0_57 = arith.constant 0 : index
    %c0_58 = arith.constant 0 : index
    %c0_59 = arith.constant 0 : index
    %c0_60 = arith.constant 0 : index
    %141 = vector.load %arg4[%c0_57, %c0_58, %c0_59, %c0_60] : memref<2x2x8x128xf32, #tpu.memory_space<vmem>>, vector<1x2x8x128xf32>
    %142 = vector.shape_cast %141 : vector<1x2x8x128xf32> to vector<2x8x128xf32>
    %143 = vector.shape_cast %134 : vector<2x8x128xf32> to vector<1x2x8x128xf32>
    tpu.vector_store %arg4[%c0_57, %c0_58, %c0_59, %c0_60], %143 {strides = array<i32>} : memref<2x2x8x128xf32, #tpu.memory_space<vmem>>, vector<1x2x8x128xf32>,
    %c1_61 = arith.constant 1 : index
    %c0_62 = arith.constant 0 : index
    %c0_63 = arith.constant 0 : index
    %c0_64 = arith.constant 0 : index
    %144 = vector.load %arg4[%c1_61, %c0_62, %c0_63, %c0_64] : memref<2x2x8x128xf32, #tpu.memory_space<vmem>>, vector<1x2x8x128xf32>
    %145 = vector.shape_cast %144 : vector<1x2x8x128xf32> to vector<2x8x128xf32>
    %146 = vector.shape_cast %140 : vector<2x8x128xf32> to vector<1x2x8x128xf32>
    tpu.vector_store %arg4[%c1_61, %c0_62, %c0_63, %c0_64], %146 {strides = array<i32>} : memref<2x2x8x128xf32, #tpu.memory_space<vmem>>, vector<1x2x8x128xf32>,
    return
  }
  func.func @transform_0(%arg0: i32, %arg1: i32) -> (i32, i32, i32, i32) {
    %c0_i32 = arith.constant 0 : i32
    %c0_i32_0 = arith.constant 0 : i32
    %c0_i32_1 = arith.constant 0 : i32
    return %c0_i32, %c0_i32_0, %arg1, %arg0 : i32, i32, i32, i32
  }
  func.func @transform_1(%arg0: i32, %arg1: i32) -> (i32, i32, i32, i32) {
    %c0_i32 = arith.constant 0 : i32
    %c0_i32_0 = arith.constant 0 : i32
    %c0_i32_1 = arith.constant 0 : i32
    %c0_i32_2 = arith.constant 0 : i32
    return %c0_i32, %c0_i32_0, %c0_i32_1, %arg0 : i32, i32, i32, i32
  }
  func.func @transform_2(%arg0: i32, %arg1: i32) -> (i32, i32, i32, i32) {
    %c0_i32 = arith.constant 0 : i32
    %c0_i32_0 = arith.constant 0 : i32
    %c0_i32_1 = arith.constant 0 : i32
    return %c0_i32, %arg1, %c0_i32_0, %arg0 : i32, i32, i32, i32
  }
}

</mosaic_0001>

<bundles_post_ra>
// kernel: reverse.0
= control target key start
LH: loop header
LB: loop body
LE: loop exit
PB: predicated region body
PF: predicated region fallthrough
CT: control target
= control target key end

     0   :  { %v72_v3 = vlaneseq  ;;  %v65_v9 = vld [vmem:[#allocation0 + $0x7] ss:$-1 sm:$0xff]  ;;  %v79_v12 = vld [vmem:[#allocation0 + $0x17] ss:$-1 sm:$0xff]  ;;  %s331_s0 = inlined_call_operand.vmem [shape: f32[2,4,16,7], index: 0, kind: input, shape index: {}]   ;;  %s332_s1 = inlined_call_operand.vmem [shape: f32[2,4,16,7], index: 1, kind: output, shape index: {}]  }
   0x1   :  { %v45_v0 = vld [vmem:[%s331_s0] sm:$0xff]  ;;  %v47_v1 = vld [vmem:[%s331_s0 + $0x8] sm:$0xff]  ;;  %v49_v2 = vld [vmem:[%s331_s0 + $0x10] sm:$0xff]  ;;  %v66_v10 = vrot.slane %v65_v9, 1  ;;  %v80_v14 = vrot.slane %v79_v12, 1 }
   0x2   :  { %46 = vst [vmem:[#allocation0 + $0x8] sm:$0xff] %v45_v0  ;;  %48 = vst [vmem:[#allocation0 + $0x18] sm:$0xff] %v47_v1  ;;  %v51_v4 = vld [vmem:[%s331_s0 + $0x18] sm:$0xff]  ;;  %v53_v5 = vld [vmem:[%s331_s0 + $0x20] sm:$0xff]  ;;  %v73_v11 = vshrl.u32 %v72_v3, 7 }
   0x3   :  { %50 = vst [vmem:[#allocation0 + $0x28] sm:$0xff] %v49_v2  ;;  %v55_v6 = vld [vmem:[%s331_s0 + $0x28] sm:$0xff]  ;;  %52 = vst [vmem:[#allocation0 + $0x38] sm:$0xff] %v51_v4  ;;  %v57_v7 = vld [vmem:[%s331_s0 + $0x30] sm:$0xff] }
   0x4   :  { %54 = vst [vmem:[#allocation0 + $0x48] sm:$0xff] %v53_v5  ;;  %56 = vst [vmem:[#allocation0 + $0x58] sm:$0xff] %v55_v6  ;;  %v59_v8 = vld [vmem:[%s331_s0 + $0x38] sm:$0xff]  ;;  %v93_v13 = vld [vmem:[#allocation0 + $0x27] ss:$-1 sm:$0xff]  ;;  %vm74_vm0 = vcmp.lt.s32.totalorder %v73_v11, 7 }
   0x5   :  { %58 = vst [vmem:[#allocation0 + $0x68] sm:$0xff] %v57_v7  ;;  %60 = vst [vmem:[#allocation0 + $0x78] sm:$0xff] %v59_v8  ;;  %v94_v15 = vrot.slane %v93_v13, 1  ;;  %v107_v16 = vld [vmem:[#allocation0 + $0x37] ss:$-1 sm:$0xff] }
   0x6   :  { %67 = vst [vmem:[#allocation1] sm:$0xff] %v66_v10  ;;  %v108_v17 = vrot.slane %v107_v16, 1  ;;  %v121_v18 = vld [vmem:[#allocation0 + $0x47] ss:$-1 sm:$0xff]  ;;  %v135_v19 = vld [vmem:[#allocation0 + $0x57] ss:$-1 sm:$0xff] }
   0x7   :  { %81 = vst [vmem:[#allocation1 + $0x8] sm:$0xff] %v80_v14  ;;  %95 = vst [vmem:[#allocation1 + $0x10] sm:$0xff] %v94_v15  ;;  %v122_v20 = vrot.slane %v121_v18, 1  ;;  %v136_v21 = vrot.slane %v135_v19, 1  ;;  %v149_v22 = vld [vmem:[#allocation0 + $0x67] ss:$-1 sm:$0xff] }
   0x8   :  { %v163_v23 = vld [vmem:[#allocation0 + $0x77] ss:$-1 sm:$0xff]  ;;  %109 = vst [vmem:[#allocation1 + $0x18] sm:$0xff] %v108_v17  ;;  %v150_v24 = vrot.slane %v149_v22, 1 }
   0x9   :  { %v164_v25 = vrot.slane %v163_v23, 1  ;;  %v70_v26 = vld [vmem:[#allocation0 + $0xf] ss:$-1 sm:$0xff]  ;;  %v84_v27 = vld [vmem:[#allocation0 + $0x1f] ss:$-1 sm:$0xff]  ;;  %123 = vst [vmem:[#allocation1 + $0x20] sm:$0xff] %v122_v20 }
   0xa   :  { %v98_v28 = vld [vmem:[#allocation0 + $0x2f] ss:$-1 sm:$0xff]  ;;  %137 = vst [vmem:[#allocation1 + $0x28] sm:$0xff] %v136_v21  ;;  %v71_v29 = vrot.slane %v70_v26, 1  ;;  %v85_v30 = vrot.slane %v84_v27, 1  ;;  %151 = vst [vmem:[#allocation1 + $0x30] sm:$0xff] %v150_v24 }
   0xb   :  { %v99_v31 = vrot.slane %v98_v28, 1  ;;  %v112_v32 = vld [vmem:[#allocation0 + $0x3f] ss:$-1 sm:$0xff]  ;;  %165 = vst [vmem:[#allocation1 + $0x38] sm:$0xff] %v164_v25  ;;  %v126_v34 = vld [vmem:[#allocation0 + $0x4f] ss:$-1 sm:$0xff] }
   0xc   :  { %v113_v33 = vrot.slane %v112_v32, 1  ;;  %v140_v35 = vld [vmem:[#allocation0 + $0x5f] ss:$-1 sm:$0xff]  ;;  %75 = vst.msk [vmem:[#allocation1] sm:$0xff] %vm74_vm0, %v71_v29  ;;  %89 = vst.msk [vmem:[#allocation1 + $0x8] sm:$0xff] %vm74_vm0, %v85_v30  ;;  %v127_v36 = vrot.slane %v126_v34, 1 }
   0xd   :  { %103 = vst.msk [vmem:[#allocation1 + $0x10] sm:$0xff] %vm74_vm0, %v99_v31  ;;  %v141_v37 = vrot.slane %v140_v35, 1  ;;  %v154_v38 = vld [vmem:[#allocation0 + $0x6f] ss:$-1 sm:$0xff]  ;;  %v168_v39 = vld [vmem:[#allocation0 + $0x7f] ss:$-1 sm:$0xff] }
   0xe   :  { %117 = vst.msk [vmem:[#allocation1 + $0x18] sm:$0xff] %vm74_vm0, %v113_v33  ;;  %v155_v40 = vrot.slane %v154_v38, 1  ;;  %v169_v41 = vrot.slane %v168_v39, 1  ;;  %131 = vst.msk [vmem:[#allocation1 + $0x20] sm:$0xff] %vm74_vm0, %v127_v36 }
   0xf   :  { %145 = vst.msk [vmem:[#allocation1 + $0x28] sm:$0xff] %vm74_vm0, %v141_v37 }
  0x10   :  { %159 = vst.msk [vmem:[#allocation1 + $0x30] sm:$0xff] %vm74_vm0, %v155_v40  ;;  %173 = vst.msk [vmem:[#allocation1 + $0x38] sm:$0xff] %vm74_vm0, %v169_v41 }
  0x13   :  { %v216_v42 = vld [vmem:[#allocation1] sm:$0xff]  ;;  %v218_v43 = vld [vmem:[#allocation1 + $0x8] sm:$0xff] }
  0x14   :  { %v220_v44 = vld [vmem:[#allocation1 + $0x10] sm:$0xff]  ;;  %217 = vst [vmem:[%s332_s1] sm:$0xff] %v216_v42  ;;  %219 = vst [vmem:[%s332_s1 + $0x8] sm:$0xff] %v218_v43 }
  0x15   :  { %221 = vst [vmem:[%s332_s1 + $0x10] sm:$0xff] %v220_v44  ;;  %v222_v45 = vld [vmem:[#allocation1 + $0x18] sm:$0xff]  ;;  %v224_v46 = vld [vmem:[#allocation1 + $0x20] sm:$0xff] }
  0x16   :  { %223 = vst [vmem:[%s332_s1 + $0x18] sm:$0xff] %v222_v45  ;;  %v226_v47 = vld [vmem:[#allocation1 + $0x28] sm:$0xff]  ;;  %225 = vst [vmem:[%s332_s1 + $0x20] sm:$0xff] %v224_v46 }
  0x17   :  { %227 = vst [vmem:[%s332_s1 + $0x28] sm:$0xff] %v226_v47  ;;  %v228_v48 = vld [vmem:[#allocation1 + $0x30] sm:$0xff]  ;;  %v230_v49 = vld [vmem:[#allocation1 + $0x38] sm:$0xff] }
  0x18   :  { %229 = vst [vmem:[%s332_s1 + $0x30] sm:$0xff] %v228_v48  ;;  %231 = vst [vmem:[%s332_s1 + $0x38] sm:$0xff] %v230_v49 }

// kernel: spectral_conv2d_fast.1
= control target key start
LH: loop header
LB: loop body
LE: loop exit
PB: predicated region body
PF: predicated region fallthrough
CT: control target
= control target key end

     0   :  { %v24_v0 = vlaneseq  ;;  %v535_v3 = vmov 1966171168   ;;  %s728_s0 = inlined_call_operand.vmem [shape: f32[4,2,2,128], index: 0, kind: input, shape index: {}]   ;;  %s729_s1 = inlined_call_operand.vmem [shape: f32[4,3,8,128], index: 1, kind: input, shape index: {}]   ;;  %s730_s2 = inlined_call_operand.vmem [shape: f32[2,2,8,128], index: 2, kind: output, shape index: {}]  }
   0x1   :  { %v554_v1 = vld [vmem:[%s728_s0] sm:$0x3]  ;;  %v514_v2 = vld [vmem:[%s728_s0 + $0x2] sm:$0x3]  ;;  %v22_v4 = vunpack.c.l.s4 %v535_v3  ;;  %v562_v6 = vld [vmem:[%s728_s0 + $0x4] sm:$0x3] }
   0x2   :  { %v25_v5 = vshrl.u32 %v24_v0, 7  ;;  %v518_v7 = vld [vmem:[%s728_s0 + $0x6] sm:$0x3]  ;;  %v19_v8 = vadd.f32 %v514_v2, %v554_v1  ;;  %v572_v11 = vld [vmem:[%s728_s0 + $0x8] sm:$0x3]  ;;  %v519_v33 = vld [vmem:[%s729_s1 + $0x18] sm:$0xff] }
   0x3   :  { %v23_v9 = vunpack.c.0.s8 %v22_v4  ;;  %v143_v10 = vadd.f32 %v518_v7, %v562_v6  ;;  %v523_v12 = vld [vmem:[%s728_s0 + $0xa] sm:$0x3]  ;;  %v583_v15 = vld [vmem:[%s728_s0 + $0xc] sm:$0x3]  ;;  %v528_v16 = vld [vmem:[%s728_s0 + $0xe] sm:$0x3] }
   0x4   :  { %v267_v14 = vadd.f32 %v523_v12, %v572_v11  ;;  %v588_v17 = vsub.s32 0, %v25_v5  ;;  %v391_v18 = vadd.f32 %v528_v16, %v583_v15  ;;  %v14_v27 = vld [vmem:[%s729_s1] sm:$0xff]  ;;  %v515_v28 = vld [vmem:[%s729_s1 + $0x8] sm:$0xff]  ;;  %v524_v35 = vld [vmem:[%s729_s1 + $0x30] sm:$0xff] }
   0x5   :  { %v577_v13 = vsub.s32 %v23_v9, %v25_v5  ;;  %v520_v34 = vld [vmem:[%s729_s1 + $0x20] sm:$0xff]  ;;  %v525_v44 = vld [vmem:[%s729_s1 + $0x38] sm:$0xff]  ;;  %v529_v45 = vld [vmem:[%s729_s1 + $0x48] sm:$0xff] }
   0x6   :  { %v638_v46 = vld [vmem:[%s729_s1 + $0x50] sm:$0xff] }
   0x7   :  { %v27_v19 = vrot.slane %v19_v8, %v577_v13  ;;  %v73_v20 = vrot.slane %v514_v2, %v577_v13  ;;  %v151_v21 = vrot.slane %v143_v10, %v577_v13  ;;  %v197_v22 = vrot.slane %v518_v7, %v577_v13 }
   0x8   :  { %v275_v23 = vrot.slane %v267_v14, %v577_v13  ;;  %v321_v24 = vrot.slane %v523_v12, %v577_v13  ;;  %v399_v25 = vrot.slane %v391_v18, %v577_v13  ;;  %v599_v26 = vrot.slane %v528_v16, %v577_v13 }
   0x9   :  { %v35_v29 = vrot.slane %v27_v19, %v577_v13  ;;  %v81_v30 = vrot.slane %v73_v20, %v577_v13  ;;  %v159_v31 = vrot.slane %v151_v21, %v577_v13  ;;  %v205_v32 = vrot.slane %v197_v22, %v577_v13 }
   0xa   :  { %v283_v36 = vrot.slane %v275_v23, %v577_v13  ;;  %v329_v37 = vrot.slane %v321_v24, %v577_v13  ;;  %v407_v38 = vrot.slane %v399_v25, %v577_v13  ;;  %v453_v39 = vrot.slane %v599_v26, %v577_v13 }
   0xb   :  { %v92_v40 = vrot.slane %v35_v29, %v588_v17  ;;  %v104_v41 = vrot.slane %v81_v30, %v588_v17  ;;  %v216_v42 = vrot.slane %v159_v31, %v588_v17  ;;  %v228_v43 = vrot.slane %v205_v32, %v588_v17 }
   0xc   :  { %v340_v47 = vrot.slane %v283_v36, %v588_v17  ;;  %v352_v48 = vrot.slane %v329_v37, %v588_v17  ;;  %v464_v49 = vrot.slane %v407_v38, %v588_v17  ;;  %v476_v50 = vrot.slane %v453_v39, %v588_v17 }
   0xd   :  { %v644_v51 = vmul.f32 %v92_v40, %v14_v27  ;;  %v111_v52 = vmul.f32 %v515_v28, %v104_v41  ;;  %v646_v53 = vmul.f32 %v519_v33, %v216_v42  ;;  %v235_v54 = vmul.f32 %v520_v34, %v228_v43 }
   0xe   :  { %v648_v55 = vmul.f32 %v524_v35, %v340_v47  ;;  %v359_v56 = vmul.f32 %v525_v44, %v352_v48  ;;  %v650_v57 = vmul.f32 %v529_v45, %v464_v49  ;;  %v483_v58 = vmul.f32 %v638_v46, %v476_v50 }
   0xf   :  { %v113_v59 = vsub.f32 %v644_v51, %v111_v52  ;;  %v237_v60 = vsub.f32 %v646_v53, %v235_v54  ;;  %v28_v61 = vcombine.high %v27_v19, %v27_v19  ;;  %v74_v62 = vcombine.high %v73_v20, %v73_v20 }
  0x10   :  { %v361_v63 = vsub.f32 %v648_v55, %v359_v56  ;;  %v485_v0 = vsub.f32 %v650_v57, %v483_v58  ;;  %v152_v2 = vcombine.high %v151_v21, %v151_v21  ;;  %v198_v3 = vcombine.high %v197_v22, %v197_v22 }
  0x11   :  { %v239_v4 = vadd.f32 %v237_v60, %v113_v59  ;;  %v42_v5 = vrot.slane %v28_v61, %v577_v13  ;;  %v88_v7 = vrot.slane %v74_v62, %v577_v13  ;;  %v276_v8 = vcombine.high %v275_v23, %v275_v23  ;;  %v526_v59 = vld [vmem:[%s729_s1 + $0x40] sm:$0xff]  ;;  %v531_v60 = vld [vmem:[%s729_s1 + $0x58] sm:$0xff] }
  0x12   :  { %v166_v9 = vrot.slane %v152_v2, %v577_v13  ;;  %v212_v10 = vrot.slane %v198_v3, %v577_v13  ;;  %v322_v12 = vcombine.high %v321_v24, %v321_v24  ;;  %v400_v14 = vcombine.high %v399_v25, %v399_v25 }
  0x13   :  { %v363_v16 = vadd.f32 %v361_v63, %v239_v4  ;;  %v96_v18 = vrot.slane %v42_v5, %v588_v17  ;;  %v108_v19 = vrot.slane %v88_v7, %v588_v17  ;;  %v290_v20 = vrot.slane %v276_v8, %v577_v13 }
  0x14   :  { %v220_v21 = vrot.slane %v166_v9, %v588_v17  ;;  %v232_v22 = vrot.slane %v212_v10, %v588_v17  ;;  %v336_v29 = vrot.slane %v322_v12, %v577_v13  ;;  %v414_v23 = vrot.slane %v400_v14, %v577_v13 }
  0x15   :  { %v487_v30 = vadd.f32 %v485_v0, %v363_v16  ;;  %v100_v31 = vmul.f32 %v96_v18, %v14_v27  ;;  %v112_v32 = vmul.f32 %v515_v28, %v108_v19  ;;  %v344_v24 = vrot.slane %v290_v20, %v588_v17 }
  0x16   :  { %v224_v25 = vmul.f32 %v519_v33, %v220_v21  ;;  %v236_v36 = vmul.f32 %v520_v34, %v232_v22  ;;  %v356_v37 = vrot.slane %v336_v29, %v588_v17  ;;  %v446_v38 = vcombine.high %v599_v26, %v599_v26 }
  0x17   :  { %505 = vst [vmem:[%s730_s2] sm:$0xff] %v487_v30  ;;  %v114_v39 = vsub.f32 %v100_v31, %v112_v32  ;;  %v348_v40 = vmul.f32 %v524_v35, %v344_v24  ;;  %v468_v41 = vrot.slane %v414_v23, %v588_v17  ;;  %v50_v27 = vrot.slane %v554_v1, %v577_v13 }
  0x18   :  { %v238_v28 = vsub.f32 %v224_v25, %v236_v36  ;;  %v360_v42 = vmul.f32 %v525_v44, %v356_v37  ;;  %v460_v33 = vrot.slane %v446_v38, %v577_v13  ;;  %v174_v34 = vrot.slane %v562_v6, %v577_v13  ;;  %v516_v44 = vld [vmem:[%s729_s1 + $0x10] sm:$0xff] }
  0x19   :  { %v472_v43 = vmul.f32 %v529_v45, %v468_v41  ;;  %v58_v26 = vrot.slane %v50_v27, %v577_v13  ;;  %v298_v47 = vrot.slane %v572_v11, %v577_v13  ;;  %v422_v35 = vrot.slane %v583_v15, %v577_v13  ;;  %v521_v45 = vld [vmem:[%s729_s1 + $0x28] sm:$0xff] }
  0x1a   :  { %v240_v48 = vadd.f32 %v238_v28, %v114_v39  ;;  %v362_v49 = vsub.f32 %v348_v40, %v360_v42  ;;  %v480_v1 = vrot.slane %v460_v33, %v588_v17  ;;  %v182_v50 = vrot.slane %v174_v34, %v577_v13 }
  0x1b   :  { %v120_v6 = vrot.slane %v58_v26, %v588_v17  ;;  %v306_v11 = vrot.slane %v298_v47, %v577_v13  ;;  %v430_v15 = vrot.slane %v422_v35, %v577_v13  ;;  %v51_v52 = vcombine.high %v50_v27, %v50_v27 }
  0x1c   :  { %v364_v54 = vadd.f32 %v362_v49, %v240_v48  ;;  %v484_v56 = vmul.f32 %v638_v46, %v480_v1  ;;  %v244_v58 = vrot.slane %v182_v50, %v588_v17  ;;  %v175_v61 = vcombine.high %v174_v34, %v174_v34 }
  0x1d   :  { %v127_v62 = vmul.f32 %v516_v44, %v120_v6  ;;  %v368_v63 = vrot.slane %v306_v11, %v588_v17  ;;  %v492_v0 = vrot.slane %v430_v15, %v588_v17  ;;  %v65_v2 = vrot.slane %v51_v52, %v577_v13 }
  0x1e   :  { %v486_v3 = vsub.f32 %v472_v43, %v484_v56  ;;  %v251_v46 = vmul.f32 %v521_v45, %v244_v58  ;;  %v189_v4 = vrot.slane %v175_v61, %v577_v13  ;;  %v299_v5 = vcombine.high %v298_v47, %v298_v47 }
  0x1f   :  { %v129_v7 = vadd.f32 %v127_v62, %v644_v51  ;;  %v375_v8 = vmul.f32 %v526_v59, %v368_v63  ;;  %v499_v9 = vmul.f32 %v531_v60, %v492_v0  ;;  %v124_v10 = vrot.slane %v65_v2, %v588_v17 }
  0x20   :  { %v488_v12 = vadd.f32 %v486_v3, %v364_v54  ;;  %v253_v14 = vadd.f32 %v251_v46, %v646_v53  ;;  %v248_v16 = vrot.slane %v189_v4, %v588_v17  ;;  %v313_v18 = vrot.slane %v299_v5, %v577_v13 }
  0x21   :  { %v377_v19 = vadd.f32 %v375_v8, %v648_v55  ;;  %v128_v20 = vmul.f32 %v516_v44, %v124_v10  ;;  %v423_v21 = vcombine.high %v422_v35, %v422_v35  ;;  %v501_v22 = vadd.f32 %v499_v9, %v650_v57 }
  0x22   :  { %506 = vst [vmem:[%s730_s2 + $0x8] sm:$0xff] %v488_v12  ;;  %v255_v51 = vadd.f32 %v253_v14, %v129_v7  ;;  %v252_v29 = vmul.f32 %v521_v45, %v248_v16  ;;  %v372_v23 = vrot.slane %v313_v18, %v588_v17 }
  0x23   :  { %v130_v30 = vadd.f32 %v128_v20, %v100_v31  ;;  %v437_v53 = vrot.slane %v423_v21, %v577_v13 }
  0x24   :  { %v379_v32 = vadd.f32 %v377_v19, %v255_v51  ;;  %v254_v24 = vadd.f32 %v252_v29, %v224_v25  ;;  %v376_v36 = vmul.f32 %v526_v59, %v372_v23 }
  0x25   :  { %v496_v55 = vrot.slane %v437_v53, %v588_v17 }
  0x26   :  { %v503_v37 = vadd.f32 %v501_v22, %v379_v32  ;;  %v256_v38 = vadd.f32 %v254_v24, %v130_v30  ;;  %v378_v39 = vadd.f32 %v376_v36, %v348_v40 }
  0x27   :  { %v500_v41 = vmul.f32 %v531_v60, %v496_v55 }
  0x28   :  { %532 = vst [vmem:[%s730_s2 + $0x10] sm:$0xff] %v503_v37  ;;  %v380_v57 = vadd.f32 %v378_v39, %v256_v38 }
  0x29   :  { %v502_v27 = vadd.f32 %v500_v41, %v472_v43 }
  0x2b   :  { %v504_v28 = vadd.f32 %v502_v27, %v380_v57 }
  0x2d   :  { %533 = vst [vmem:[%s730_s2 + $0x18] sm:$0xff] %v504_v28 }

</bundles_post_ra>
